<compile_context>
chip_gen: v5e
topology: v5e:2x2
jax: 0.10.0
libtpu: 0.0.40
codegen_flags: <defaults>
</compile_context>

<pallas_src>
import functools

import jax
import jax.numpy as jnp
from jax.experimental import pallas as pl
from jax.experimental.pallas import tpu as pltpu


def _round_up(n, m):
    return ((n + m - 1) // m) * m


def _cdiv(a, b):
    return (a + b - 1) // b


# --------------------------------------------------------------------------- #
# Kernel body: fused  x + (Linear -> ReLU -> Linear)(x) * multiplier  on one
# (TM, D) row tile.  Weights stay VMEM-resident across the whole grid.
# --------------------------------------------------------------------------- #
def _hypernet_kernel(x_ref, w1_ref, b1_ref, w2_ref, b2_ref, o_ref, *, multiplier):
    x = x_ref[...]                                    # [TM, D], input dtype
    x_mxu = x.astype(jnp.bfloat16)                    # bf16 MXU operand (no-op if bf16 in)

    # Linear 1 + ReLU: bf16 matmul, f32 accumulation, f32 bias/ReLU (VPU).
    h = jnp.dot(x_mxu, w1_ref[...], preferred_element_type=jnp.float32)   # [TM, Hp]
    h = jnp.maximum(h + b1_ref[...], 0.0)

    # Linear 2 (output layer, no activation).  bf16 cast of the largest live
    # intermediate halves vreg/VMEM pressure; accumulation stays f32.
    y = jnp.dot(h.astype(jnp.bfloat16), w2_ref[...],
                preferred_element_type=jnp.float32)   # [TM, D]
    y = y + b2_ref[...]

    # Residual with multiplier; elementwise path stays f32 (v5e-safe).
    o_ref[...] = (x.astype(jnp.float32) + y * multiplier).astype(o_ref.dtype)


# --------------------------------------------------------------------------- #
# One-time parameter preparation (call once, reuse every forward).
#   w1: [D, H]  b1: [H] or [1, H]   w2: [H, D]  b2: [D] or [1, D]
# Hidden dim H is zero-padded to a multiple of 128 (exact: padded W1 columns
# and b1 entries are zero -> relu(0)=0, padded W2 rows are zero -> no effect).
# --------------------------------------------------------------------------- #
def prepare_params(params):
    w1 = jnp.asarray(params["w1"])
    b1 = jnp.asarray(params["b1"]).reshape(1, -1)
    w2 = jnp.asarray(params["w2"])
    b2 = jnp.asarray(params["b2"]).reshape(1, -1)
    D, H = w1.shape
    assert w2.shape == (H, D)
    Hp = _round_up(H, 128)
    return {
        "w1": jnp.pad(w1, ((0, 0), (0, Hp - H))).astype(jnp.bfloat16),
        "b1": jnp.pad(b1, ((0, 0), (0, Hp - H))).astype(jnp.float32),
        "w2": jnp.pad(w2, ((0, Hp - H), (0, 0))).astype(jnp.bfloat16),
        "b2": b2.astype(jnp.float32),
    }


def _pick_tiling(M, D, Hp, weight_bytes, x_itemsize):
    """Generation-aware row-tile size and scoped-VMEM limit."""
    try:
        vmem_phys = pltpu.get_tpu_info().vmem_capacity_bytes
    except Exception:  # no hardware info available -> assume the small-VMEM chip
        vmem_phys = 64 << 20
    big_vmem = vmem_phys >= (96 << 20)          # v5e/v6e: 128 MiB, v7x: 64 MiB
    vmem_limit = (100 << 20) if big_vmem else (56 << 20)
    tm_cap = 1024 if big_vmem else 512

    # Per-row VMEM: x + out double-buffered tiles, f32 h, bf16 copies of x/h.
    bytes_per_row = 4 * D * x_itemsize + 2 * D + 6 * Hp
    budget = vmem_limit - weight_bytes - (8 << 20)      # headroom
    tm_fit = max(256, (budget // max(bytes_per_row, 1)) // 256 * 256)
    tm = min(tm_cap, tm_fit)

    if M <= tm:
        tm = _round_up(M, 8)                    # single tile covers all rows
    elif not big_vmem:
        # v7x: keep >= 2 grid steps so the "parallel" axis spans both TCs.
        tm = min(tm, _round_up(_cdiv(M, 2), 256))
    return tm, vmem_limit


# --------------------------------------------------------------------------- #
# Forward on a flat [M, D] activation matrix.
# --------------------------------------------------------------------------- #
def hypernetwork_forward(x2d, prepared, multiplier=1.0):
    M, D = x2d.shape
    w1, b1, w2, b2 = prepared["w1"], prepared["b1"], prepared["w2"], prepared["b2"]
    Hp = w1.shape[1]
    assert w1.shape[0] == D and w2.shape == (Hp, D)

    weight_bytes = (w1.size + w2.size) * 2 + (b1.size + b2.size) * 4
    itemsize = jnp.dtype(x2d.dtype).itemsize
    TM, vmem_limit = _pick_tiling(M, D, Hp, weight_bytes, itemsize)
    grid = (_cdiv(M, TM),)                       # partial last tile allowed

    # TODO(synk): multiplier is baked in (module default 1.0); if it must vary
    # at runtime pass it as an SMEM scalar instead of a Python constant.
    kernel = functools.partial(_hypernet_kernel, multiplier=float(multiplier))

    cost = pl.CostEstimate(
        flops=4 * M * D * Hp,                    # two matmuls
        transcendentals=0,
        bytes_accessed=2 * M * D * itemsize + weight_bytes,
    )

    def build(single_buffer_weights):
        def const_spec(shape):
            if single_buffer_weights:
                return pl.BlockSpec(shape, lambda i: (0,) * len(shape),
                                    pipeline_mode=pl.Buffered(1))
            return pl.BlockSpec(shape, lambda i: (0,) * len(shape))

        return pl.pallas_call(
            kernel,
            out_shape=jax.ShapeDtypeStruct((M, D), x2d.dtype),
            grid=grid,
            in_specs=[
                pl.BlockSpec((TM, D), lambda i: (i, 0)),   # x rows, pipelined
                const_spec((D, Hp)),                       # W1 resident
                const_spec((1, Hp)),                       # b1 resident
                const_spec((Hp, D)),                       # W2 resident
                const_spec((1, D)),                        # b2 resident
            ],
            out_specs=pl.BlockSpec((TM, D), lambda i: (i, 0)),
            compiler_params=pltpu.CompilerParams(
                dimension_semantics=("parallel",),         # megacore row split
                vmem_limit_bytes=vmem_limit,
            ),
            cost_estimate=cost,
        )

    # TODO(synk): for very large dims (bf16 W1+W2 no longer VMEM-resident on
    # v7x, D >~ 2048) add a K-streaming grid axis with a VMEM accumulator.
    try:
        return build(single_buffer_weights=True)(x2d, w1, b1, w2, b2)
    except Exception:
        # Fallback if this jax version doesn't honor pl.Buffered(1) on the
        # default pallas_call pipeline: default (double) buffering.
        return build(single_buffer_weights=False)(x2d, w1, b1, w2, b2)


def hypernetwork_module_apply(x, prepared_params, multiplier=1.0):
    """x: [..., dim] -> same shape.  Reshape glue stays in JAX."""
    shape = x.shape
    x2d = x.reshape(-1, shape[-1])
    out2d = hypernetwork_forward(x2d, prepared_params, multiplier)
    return out2d.reshape(shape)


# --------------------------------------------------------------------------- #
# Init matching weight_init='Normal': weights ~ N(0, 0.01), biases = 0.
# PyTorch Linear.weight is [out, in]; we store the transpose [in, out].
# --------------------------------------------------------------------------- #
def init_params(key, dim, layer_structure=(1, 2, 1)):
    d_in = int(dim * layer_structure[0])
    d_mid = int(dim * layer_structure[1])
    d_out = int(dim * layer_structure[2])
    k1, k2 = jax.random.split(key, 2)
    w1 = jax.random.normal(k1, (d_in, d_mid), dtype=jnp.float32) * 0.01
    b1 = jnp.zeros((1, d_mid), dtype=jnp.float32)
    w2 = jax.random.normal(k2, (d_mid, d_out), dtype=jnp.float32) * 0.01
    b2 = jnp.zeros((1, d_out), dtype=jnp.float32)
    return {"w1": w1, "b1": b1, "w2": w2, "b2": b2}


def _reference(x, params, multiplier=1.0):
    """Pure-JAX f32 reference."""
    h = jnp.maximum(x @ params["w1"] + params["b1"], 0.0)
    y = h @ params["w2"] + params["b2"]
    return x + y * multiplier


if __name__ == "__main__":
    key = jax.random.PRNGKey(0)
    k_x, k_p = jax.random.split(key)

    batch, seq, dim = 2, 8, 32          # small shapes consistent with the module
    x = jax.random.normal(k_x, (batch, seq, dim), dtype=jnp.float32)
    params = init_params(k_p, dim, layer_structure=(1, 2, 1))
    prepared = prepare_params(params)   # one-time pad/cast of weights

    out = hypernetwork_module_apply(x, prepared, multiplier=1.0)
    out = jax.block_until_ready(out)

    ref = _reference(x.reshape(-1, dim), params).reshape(batch, seq, dim)
    assert out.shape == x.shape
    # bf16 MXU operands (f32 accumulation): loosened tolerance vs. pure-f32 ref.
    assert jnp.allclose(out, ref, atol=1e-2, rtol=1e-2), "mismatch vs reference"

    # TODO(synk): torch.nn.Dropout (train-mode only) and optional LayerNorm
    # (add_layer_norm=False default) are omitted; both are identity here.
    print("KERNEL_OK")
</pallas_src>

<mosaic_0001>
module attributes {stable_mosaic.version = 11 : i64} {
  func.func @_hypernet_kernel(%arg0: i32, %arg1: memref<16x32xf32, #tpu.memory_space<vmem>>, %arg2: memref<32x128xbf16, #tpu.memory_space<vmem>>, %arg3: memref<1x128xf32, #tpu.memory_space<vmem>>, %arg4: memref<128x32xbf16, #tpu.memory_space<vmem>>, %arg5: memref<1x32xf32, #tpu.memory_space<vmem>>, %arg6: memref<16x32xf32, #tpu.memory_space<vmem>>) attributes {dimension_semantics = [#tpu.dimension_semantics<parallel>], iteration_bounds = array<i64: 1>, scalar_prefetch = 0 : i64, scratch_operands = 0 : i64, tpu.core_type = #tpu.core_type<tc>, window_params = [{transform_indices = @transform_0, window_bounds = array<i64: 16, 32>}, {pipeline_mode = #tpu.pipeline_mode<synchronous>, transform_indices = @transform_1, window_bounds = array<i64: 32, 128>}, {pipeline_mode = #tpu.pipeline_mode<synchronous>, transform_indices = @transform_2, window_bounds = array<i64: 1, 128>}, {pipeline_mode = #tpu.pipeline_mode<synchronous>, transform_indices = @transform_3, window_bounds = array<i64: 128, 32>}, {pipeline_mode = #tpu.pipeline_mode<synchronous>, transform_indices = @transform_4, window_bounds = array<i64: 1, 32>}, {transform_indices = @transform_5, window_bounds = array<i64: 16, 32>}]} {
    %c0 = arith.constant 0 : index
    %c0_0 = arith.constant 0 : index
    %0 = vector.load %arg1[%c0, %c0_0] : memref<16x32xf32, #tpu.memory_space<vmem>>, vector<16x32xf32>
    %1 = arith.truncf %0 : vector<16x32xf32> to vector<16x32xbf16>
    %c0_1 = arith.constant 0 : index
    %c0_2 = arith.constant 0 : index
    %2 = vector.load %arg2[%c0_1, %c0_2] : memref<32x128xbf16, #tpu.memory_space<vmem>>, vector<32x128xbf16>
    %cst = arith.constant dense<0.000000e+00> : vector<16x128xf32>
    %3 = tpu.matmul %1, %2, %cst {dimension_numbers = #tpu.dot_dimension_numbers<[1], [0], [0], [1], [0, 0, 1, 1], [], []>} : vector<16x32xbf16>, vector<32x128xbf16>, vector<16x128xf32> -> vector<16x128xf32>
    %c0_3 = arith.constant 0 : index
    %c0_4 = arith.constant 0 : index
    %4 = vector.load %arg3[%c0_3, %c0_4] : memref<1x128xf32, #tpu.memory_space<vmem>>, vector<1x128xf32>
    %5 = vector.broadcast %4 : vector<1x128xf32> to vector<16x128xf32>
    %6 = arith.addf %3, %5 : vector<16x128xf32>
    %cst_5 = arith.constant 0.000000e+00 : f32
    %7 = vector.broadcast %cst_5 : f32 to vector<16x128xf32>
    %8 = arith.maximumf %6, %7 : vector<16x128xf32>
    %9 = arith.truncf %8 : vector<16x128xf32> to vector<16x128xbf16>
    %c0_6 = arith.constant 0 : index
    %c0_7 = arith.constant 0 : index
    %10 = vector.load %arg4[%c0_6, %c0_7] : memref<128x32xbf16, #tpu.memory_space<vmem>>, vector<128x32xbf16>
    %cst_8 = arith.constant dense<0.000000e+00> : vector<16x32xf32>
    %11 = tpu.matmul %9, %10, %cst_8 {dimension_numbers = #tpu.dot_dimension_numbers<[1], [0], [0], [1], [0, 0, 1, 1], [], []>} : vector<16x128xbf16>, vector<128x32xbf16>, vector<16x32xf32> -> vector<16x32xf32>
    %c0_9 = arith.constant 0 : index
    %c0_10 = arith.constant 0 : index
    %12 = vector.load %arg5[%c0_9, %c0_10] : memref<1x32xf32, #tpu.memory_space<vmem>>, vector<1x32xf32>
    %13 = vector.broadcast %12 : vector<1x32xf32> to vector<16x32xf32>
    %14 = arith.addf %11, %13 : vector<16x32xf32>
    %cst_11 = arith.constant 1.000000e+00 : f32
    %15 = vector.broadcast %cst_11 : f32 to vector<16x32xf32>
    %16 = arith.mulf %14, %15 : vector<16x32xf32>
    %17 = arith.addf %0, %16 : vector<16x32xf32>
    %c0_12 = arith.constant 0 : index
    %c0_13 = arith.constant 0 : index
    %18 = vector.load %arg6[%c0_12, %c0_13] : memref<16x32xf32, #tpu.memory_space<vmem>>, vector<16x32xf32>
    tpu.vector_store %arg6[%c0_12, %c0_13], %17 {strides = array<i32>} : memref<16x32xf32, #tpu.memory_space<vmem>>, vector<16x32xf32>,
    return
  }
  func.func @transform_0(%arg0: i32) -> (i32, i32) {
    %c0_i32 = arith.constant 0 : i32
    %c0_i32_0 = arith.constant 0 : i32
    return %arg0, %c0_i32 : i32, i32
  }
  func.func @transform_1(%arg0: i32) -> (i32, i32) {
    %c0_i32 = arith.constant 0 : i32
    %c0_i32_0 = arith.constant 0 : i32
    %c0_i32_1 = arith.constant 0 : i32
    return %c0_i32, %c0_i32_0 : i32, i32
  }
  func.func @transform_2(%arg0: i32) -> (i32, i32) {
    %c0_i32 = arith.constant 0 : i32
    %c0_i32_0 = arith.constant 0 : i32
    %c0_i32_1 = arith.constant 0 : i32
    return %c0_i32, %c0_i32_0 : i32, i32
  }
  func.func @transform_3(%arg0: i32) -> (i32, i32) {
    %c0_i32 = arith.constant 0 : i32
    %c0_i32_0 = arith.constant 0 : i32
    %c0_i32_1 = arith.constant 0 : i32
    return %c0_i32, %c0_i32_0 : i32, i32
  }
  func.func @transform_4(%arg0: i32) -> (i32, i32) {
    %c0_i32 = arith.constant 0 : i32
    %c0_i32_0 = arith.constant 0 : i32
    %c0_i32_1 = arith.constant 0 : i32
    return %c0_i32, %c0_i32_0 : i32, i32
  }
  func.func @transform_5(%arg0: i32) -> (i32, i32) {
    %c0_i32 = arith.constant 0 : i32
    %c0_i32_0 = arith.constant 0 : i32
    return %arg0, %c0_i32 : i32, i32
  }
}

module attributes {stable_mosaic.version = 11 : i64} {
  func.func @_hypernet_kernel(%arg0: i32, %arg1: memref<16x32xf32, #tpu.memory_space<vmem>>, %arg2: memref<32x128xbf16, #tpu.memory_space<vmem>>, %arg3: memref<1x128xf32, #tpu.memory_space<vmem>>, %arg4: memref<128x32xbf16, #tpu.memory_space<vmem>>, %arg5: memref<1x32xf32, #tpu.memory_space<vmem>>, %arg6: memref<16x32xf32, #tpu.memory_space<vmem>>) attributes {dimension_semantics = [#tpu.dimension_semantics<parallel>], iteration_bounds = array<i64: 1>, scalar_prefetch = 0 : i64, scratch_operands = 0 : i64, tpu.core_type = #tpu.core_type<tc>, window_params = [{transform_indices = @transform_0, window_bounds = array<i64: 16, 32>}, {pipeline_mode = #tpu.pipeline_mode<synchronous>, transform_indices = @transform_1, window_bounds = array<i64: 32, 128>}, {pipeline_mode = #tpu.pipeline_mode<synchronous>, transform_indices = @transform_2, window_bounds = array<i64: 1, 128>}, {pipeline_mode = #tpu.pipeline_mode<synchronous>, transform_indices = @transform_3, window_bounds = array<i64: 128, 32>}, {pipeline_mode = #tpu.pipeline_mode<synchronous>, transform_indices = @transform_4, window_bounds = array<i64: 1, 32>}, {transform_indices = @transform_5, window_bounds = array<i64: 16, 32>}]} {
    %c0 = arith.constant 0 : index
    %c0_0 = arith.constant 0 : index
    %0 = vector.load %arg1[%c0, %c0_0] : memref<16x32xf32, #tpu.memory_space<vmem>>, vector<16x32xf32>
    %1 = arith.truncf %0 : vector<16x32xf32> to vector<16x32xbf16>
    %c0_1 = arith.constant 0 : index
    %c0_2 = arith.constant 0 : index
    %2 = vector.load %arg2[%c0_1, %c0_2] : memref<32x128xbf16, #tpu.memory_space<vmem>>, vector<32x128xbf16>
    %cst = arith.constant dense<0.000000e+00> : vector<16x128xf32>
    %3 = tpu.matmul %1, %2, %cst {dimension_numbers = #tpu.dot_dimension_numbers<[1], [0], [0], [1], [0, 0, 1, 1], [], []>} : vector<16x32xbf16>, vector<32x128xbf16>, vector<16x128xf32> -> vector<16x128xf32>
    %c0_3 = arith.constant 0 : index
    %c0_4 = arith.constant 0 : index
    %4 = vector.load %arg3[%c0_3, %c0_4] : memref<1x128xf32, #tpu.memory_space<vmem>>, vector<1x128xf32>
    %5 = vector.broadcast %4 : vector<1x128xf32> to vector<16x128xf32>
    %6 = arith.addf %3, %5 : vector<16x128xf32>
    %cst_5 = arith.constant 0.000000e+00 : f32
    %7 = vector.broadcast %cst_5 : f32 to vector<16x128xf32>
    %8 = arith.maximumf %6, %7 : vector<16x128xf32>
    %9 = arith.truncf %8 : vector<16x128xf32> to vector<16x128xbf16>
    %c0_6 = arith.constant 0 : index
    %c0_7 = arith.constant 0 : index
    %10 = vector.load %arg4[%c0_6, %c0_7] : memref<128x32xbf16, #tpu.memory_space<vmem>>, vector<128x32xbf16>
    %cst_8 = arith.constant dense<0.000000e+00> : vector<16x32xf32>
    %11 = tpu.matmul %9, %10, %cst_8 {dimension_numbers = #tpu.dot_dimension_numbers<[1], [0], [0], [1], [0, 0, 1, 1], [], []>} : vector<16x128xbf16>, vector<128x32xbf16>, vector<16x32xf32> -> vector<16x32xf32>
    %c0_9 = arith.constant 0 : index
    %c0_10 = arith.constant 0 : index
    %12 = vector.load %arg5[%c0_9, %c0_10] : memref<1x32xf32, #tpu.memory_space<vmem>>, vector<1x32xf32>
    %13 = vector.broadcast %12 : vector<1x32xf32> to vector<16x32xf32>
    %14 = arith.addf %11, %13 : vector<16x32xf32>
    %cst_11 = arith.constant 1.000000e+00 : f32
    %15 = vector.broadcast %cst_11 : f32 to vector<16x32xf32>
    %16 = arith.mulf %14, %15 : vector<16x32xf32>
    %17 = arith.addf %0, %16 : vector<16x32xf32>
    %c0_12 = arith.constant 0 : index
    %c0_13 = arith.constant 0 : index
    %18 = vector.load %arg6[%c0_12, %c0_13] : memref<16x32xf32, #tpu.memory_space<vmem>>, vector<16x32xf32>
    tpu.vector_store %arg6[%c0_12, %c0_13], %17 {strides = array<i32>} : memref<16x32xf32, #tpu.memory_space<vmem>>, vector<16x32xf32>,
    return
  }
  func.func @transform_0(%arg0: i32) -> (i32, i32) {
    %c0_i32 = arith.constant 0 : i32
    %c0_i32_0 = arith.constant 0 : i32
    return %arg0, %c0_i32 : i32, i32
  }
  func.func @transform_1(%arg0: i32) -> (i32, i32) {
    %c0_i32 = arith.constant 0 : i32
    %c0_i32_0 = arith.constant 0 : i32
    %c0_i32_1 = arith.constant 0 : i32
    return %c0_i32, %c0_i32_0 : i32, i32
  }
  func.func @transform_2(%arg0: i32) -> (i32, i32) {
    %c0_i32 = arith.constant 0 : i32
    %c0_i32_0 = arith.constant 0 : i32
    %c0_i32_1 = arith.constant 0 : i32
    return %c0_i32, %c0_i32_0 : i32, i32
  }
  func.func @transform_3(%arg0: i32) -> (i32, i32) {
    %c0_i32 = arith.constant 0 : i32
    %c0_i32_0 = arith.constant 0 : i32
    %c0_i32_1 = arith.constant 0 : i32
    return %c0_i32, %c0_i32_0 : i32, i32
  }
  func.func @transform_4(%arg0: i32) -> (i32, i32) {
    %c0_i32 = arith.constant 0 : i32
    %c0_i32_0 = arith.constant 0 : i32
    %c0_i32_1 = arith.constant 0 : i32
    return %c0_i32, %c0_i32_0 : i32, i32
  }
  func.func @transform_5(%arg0: i32) -> (i32, i32) {
    %c0_i32 = arith.constant 0 : i32
    %c0_i32_0 = arith.constant 0 : i32
    return %arg0, %c0_i32 : i32, i32
  }
}

</mosaic_0001>

<bundles_post_ra>
// kernel: tpu_custom_call.1
= control target key start
LH: loop header
LB: loop body
LE: loop exit
PB: predicated region body
PF: predicated region fallthrough
CT: control target
= control target key end

     0   :  { %s333_s0 = inlined_call_operand.vmem [shape: f32[16,32], index: 0, kind: input, shape index: {}]   ;;  %s334_s1 = inlined_call_operand.vmem [shape: bf16[32,128], index: 1, kind: input, shape index: {}]   ;;  %s335_s2 = inlined_call_operand.vmem [shape: f32[1,128], index: 2, kind: input, shape index: {}]   ;;  %s336_s3 = inlined_call_operand.vmem [shape: bf16[128,32], index: 3, kind: input, shape index: {}]   ;;  %s337_s4 = inlined_call_operand.vmem [shape: f32[1,32], index: 4, kind: input, shape index: {}]   ;;  %s338_s5 = inlined_call_operand.hbm [shape: f32[16,32], index: 5, kind: output, shape index: {}]  }
   0x1   :  { %v212_v0 = vld [vmem:[%s334_s1 + $0x8] sm:$0xff]  ;;  %v211_v1 = vld [vmem:[%s334_s1] sm:$0xff]  ;;  %v220_v2 = vld [vmem:[%s336_s3 + $0x38] sm:$0xff] }
   0x2   :  { %55 = vmatpush.bf16.msra.mxu0 %v212_v0  ;;  %v22_v3 = vld [vmem:[%s333_s0] sm:$0xff]  ;;  %v23_v4 = vld [vmem:[%s333_s0 + $0x8] sm:$0xff]  ;;  %134 = vmatpush.bf16.msra.mxu1 %v220_v2  ;;  %v219_v5 = vld [vmem:[%s336_s3 + $0x30] sm:$0xff] }
   0x3   :  { %10 = vsyncpa [#allocation3], 0  ;;  %v24_v6 = vpack.c.bf16 %v23_v4, %v22_v3  ;;  %vm45_vm0 = vcmask 261120   ;;  %v218_v7 = vld [vmem:[%s336_s3 + $0x28] sm:$0xff]  ;;  %v217_v8 = vld [vmem:[%s336_s3 + $0x20] sm:$0xff]  ;;  %s158_s21 = sshll.u32 %s338_s5, 4  ;;  %s159_s21 = int_to_ptr.hbm [resolvable:$true] %s158_s21 }
   0x4   :  { %v216_v9 = vld [vmem:[%s336_s3 + $0x18] sm:$0xff]  ;;  %v215_v10 = vld [vmem:[%s336_s3 + $0x10] sm:$0xff]  ;;  %v214_v11 = vld [vmem:[%s336_s3 + $0x8] sm:$0xff]  ;;  %s253_s22 = smov 128  }
   0x5   :  { %v213_v12 = vld [vmem:[%s336_s3] sm:$0xff]  ;;  %s252_s3 = smov [#allocation2]  }
   0x6   :  { %56 = vmatpush.bf16.msra.mxu0 %v211_v1  ;;  %135 = vmatpush.bf16.msra.mxu1 %v219_v5  ;;  %v224_v14 = vld [vmem:[%s335_s2] ss:$0 sm:$0xff]  ;;  %s156_s19 = sshll.u32 %s252_s3, 4  ;;  %s157_s19 = int_to_ptr.vmem [resolvable:$true] %s156_s19 }
   0x7   :  { %v225_v21 = vld [vmem:[%s337_s4] ss:$0 sm:$0xff]  ;;  %s254_s4 = smov 8  }
   0x9   :  { %178 = vmatmul.msk.bf16.vlgmr.msra.gmra.mxu0 %vm45_vm0, %v24_v6 }
   0xa   :  { %136 = vmatpush.bf16.msra.mxu1 %v218_v7 }
   0xe   :  { %137 = vmatpush.bf16.msra.mxu1 %v217_v8 }
  0x12   :  { %138 = vmatpush.bf16.msra.mxu1 %v216_v9 }
  0x16   :  { %139 = vmatpush.bf16.msra.mxu1 %v215_v10 }
  0x1a   :  { %140 = vmatpush.bf16.msra.mxu1 %v214_v11 }
  0x1e   :  { %141 = vmatpush.bf16.msra.mxu1 %v213_v12 }
  0x86   :  { %v58_v13 = vpop.f32.mrf.mxu0 }
  0x87   :  { %v59_v15 = vadd.f32 %v224_v14, %v58_v13 }
  0x89   :  { %v63_v18 = vmax.f32 %v59_v15, 0.0 }
  0x8e   :  { %v60_v16 = vpop.f32.mrf.mxu0 }
  0x8f   :  { %v61_v17 = vadd.f32 %v224_v14, %v60_v16 }
  0x91   :  { %v64_v19 = vmax.f32 %v61_v17, 0.0 }
  0x93   :  { %v65_v20 = vpack.c.bf16 %v64_v19, %v63_v18 }
  0x95   :  { %142 = vmatmul.bf16.vlgmr.msra.gmra.mxu1 %v65_v20 }
 0x112   :  { %v143_v22 = vpop.f32.mrf.mxu1 }
 0x113   :  { %v144_v23 = vadd.f32 %v225_v21, %v143_v22 }
 0x115   :  { %v148_v24 = vadd.f32 %v144_v23, %v22_v3 }
 0x117   :  { %150 = vst.msk [vmem:[#allocation2] sm:$0xff] %vm45_vm0, %v148_v24 }
 0x11a   :  { %v145_v25 = vpop.f32.mrf.mxu1 }
 0x11b   :  { %v146_v26 = vadd.f32 %v225_v21, %v145_v25 }
 0x11d   :  { %v149_v27 = vadd.f32 %v146_v26, %v23_v4 }
 0x11f   :  { %151 = vst.msk [vmem:[#allocation2 + $0x8] sm:$0xff] %vm45_vm0, %v149_v27 }
 0x120   :  { %164 = dma.vmem_to_hbm [thread:$0]  %s157_s19, 256, %s159_s21, [#allocation3], %s253_s22, %s253_s22, %s254_s4  }
 0x121   :  { %250 = dma.done.wait [#allocation3], 256  }
 0x122   :  { %251 = vsyncadd [#allocation3], 4294967040 }
 0x123   :  { %169 = vsyncpa [#allocation3], 1 }

// kernel: tpu_custom_call.1
= control target key start
LH: loop header
LB: loop body
LE: loop exit
PB: predicated region body
PF: predicated region fallthrough
CT: control target
= control target key end

     0   :  { %s333_s0 = inlined_call_operand.vmem [shape: f32[16,32], index: 0, kind: input, shape index: {}]   ;;  %s334_s1 = inlined_call_operand.vmem [shape: bf16[32,128], index: 1, kind: input, shape index: {}]   ;;  %s335_s2 = inlined_call_operand.vmem [shape: f32[1,128], index: 2, kind: input, shape index: {}]   ;;  %s336_s3 = inlined_call_operand.vmem [shape: bf16[128,32], index: 3, kind: input, shape index: {}]   ;;  %s337_s4 = inlined_call_operand.vmem [shape: f32[1,32], index: 4, kind: input, shape index: {}]   ;;  %s338_s5 = inlined_call_operand.hbm [shape: f32[16,32], index: 5, kind: output, shape index: {}]  }
   0x1   :  { %v212_v0 = vld [vmem:[%s334_s1 + $0x8] sm:$0xff]  ;;  %v211_v1 = vld [vmem:[%s334_s1] sm:$0xff]  ;;  %v220_v2 = vld [vmem:[%s336_s3 + $0x38] sm:$0xff] }
   0x2   :  { %55 = vmatpush.bf16.msra.mxu0 %v212_v0  ;;  %v22_v3 = vld [vmem:[%s333_s0] sm:$0xff]  ;;  %v23_v4 = vld [vmem:[%s333_s0 + $0x8] sm:$0xff]  ;;  %134 = vmatpush.bf16.msra.mxu1 %v220_v2  ;;  %v219_v5 = vld [vmem:[%s336_s3 + $0x30] sm:$0xff] }
   0x3   :  { %10 = vsyncpa [#allocation3], 0  ;;  %v24_v6 = vpack.c.bf16 %v23_v4, %v22_v3  ;;  %vm45_vm0 = vcmask 261120   ;;  %v218_v7 = vld [vmem:[%s336_s3 + $0x28] sm:$0xff]  ;;  %v217_v8 = vld [vmem:[%s336_s3 + $0x20] sm:$0xff]  ;;  %s158_s21 = sshll.u32 %s338_s5, 4  ;;  %s159_s21 = int_to_ptr.hbm [resolvable:$true] %s158_s21 }
   0x4   :  { %v216_v9 = vld [vmem:[%s336_s3 + $0x18] sm:$0xff]  ;;  %v215_v10 = vld [vmem:[%s336_s3 + $0x10] sm:$0xff]  ;;  %v214_v11 = vld [vmem:[%s336_s3 + $0x8] sm:$0xff]  ;;  %s253_s22 = smov 128  }
   0x5   :  { %v213_v12 = vld [vmem:[%s336_s3] sm:$0xff]  ;;  %s252_s3 = smov [#allocation2]  }
   0x6   :  { %56 = vmatpush.bf16.msra.mxu0 %v211_v1  ;;  %135 = vmatpush.bf16.msra.mxu1 %v219_v5  ;;  %v224_v14 = vld [vmem:[%s335_s2] ss:$0 sm:$0xff]  ;;  %s156_s19 = sshll.u32 %s252_s3, 4  ;;  %s157_s19 = int_to_ptr.vmem [resolvable:$true] %s156_s19 }
   0x7   :  { %v225_v21 = vld [vmem:[%s337_s4] ss:$0 sm:$0xff]  ;;  %s254_s4 = smov 8  }
   0x9   :  { %178 = vmatmul.msk.bf16.vlgmr.msra.gmra.mxu0 %vm45_vm0, %v24_v6 }
   0xa   :  { %136 = vmatpush.bf16.msra.mxu1 %v218_v7 }
   0xe   :  { %137 = vmatpush.bf16.msra.mxu1 %v217_v8 }
  0x12   :  { %138 = vmatpush.bf16.msra.mxu1 %v216_v9 }
  0x16   :  { %139 = vmatpush.bf16.msra.mxu1 %v215_v10 }
  0x1a   :  { %140 = vmatpush.bf16.msra.mxu1 %v214_v11 }
  0x1e   :  { %141 = vmatpush.bf16.msra.mxu1 %v213_v12 }
  0x86   :  { %v58_v13 = vpop.f32.mrf.mxu0 }
  0x87   :  { %v59_v15 = vadd.f32 %v224_v14, %v58_v13 }
  0x89   :  { %v63_v18 = vmax.f32 %v59_v15, 0.0 }
  0x8e   :  { %v60_v16 = vpop.f32.mrf.mxu0 }
  0x8f   :  { %v61_v17 = vadd.f32 %v224_v14, %v60_v16 }
  0x91   :  { %v64_v19 = vmax.f32 %v61_v17, 0.0 }
  0x93   :  { %v65_v20 = vpack.c.bf16 %v64_v19, %v63_v18 }
  0x95   :  { %142 = vmatmul.bf16.vlgmr.msra.gmra.mxu1 %v65_v20 }
 0x112   :  { %v143_v22 = vpop.f32.mrf.mxu1 }
 0x113   :  { %v144_v23 = vadd.f32 %v225_v21, %v143_v22 }
 0x115   :  { %v148_v24 = vadd.f32 %v144_v23, %v22_v3 }
 0x117   :  { %150 = vst.msk [vmem:[#allocation2] sm:$0xff] %vm45_vm0, %v148_v24 }
 0x11a   :  { %v145_v25 = vpop.f32.mrf.mxu1 }
 0x11b   :  { %v146_v26 = vadd.f32 %v225_v21, %v145_v25 }
 0x11d   :  { %v149_v27 = vadd.f32 %v146_v26, %v23_v4 }
 0x11f   :  { %151 = vst.msk [vmem:[#allocation2 + $0x8] sm:$0xff] %vm45_vm0, %v149_v27 }
 0x120   :  { %164 = dma.vmem_to_hbm [thread:$0]  %s157_s19, 256, %s159_s21, [#allocation3], %s253_s22, %s253_s22, %s254_s4  }
 0x121   :  { %250 = dma.done.wait [#allocation3], 256  }
 0x122   :  { %251 = vsyncadd [#allocation3], 4294967040 }
 0x123   :  { %169 = vsyncpa [#allocation3], 1 }

</bundles_post_ra>
